<compile_context>
chip_gen: v6e
topology: v6e:2x2x1
jax: 0.10.0
libtpu: 0.0.40
codegen_flags: <defaults>
</compile_context>

<pallas_src>
import functools

import jax
import jax.numpy as jnp
from jax import lax
from jax.experimental import pallas as pl
from jax.experimental.pallas import tpu as pltpu

ACT_DTYPE = jnp.bfloat16  # storage dtype for activations / weights (HBM traffic)


# ----------------------------------------------------------------------------
# One-time probe of pltpu.roll's rotation direction (guards against convention
# differences across jax versions; resolved to a Python bool before tracing).
# ----------------------------------------------------------------------------
@functools.lru_cache(maxsize=1)
def _roll_matches_numpy() -> bool:
    def k(x_ref, o_ref):
        o_ref[...] = pltpu.roll(x_ref[...], 1, 1)

    x = jnp.tile(jnp.arange(128, dtype=jnp.float32)[None, :], (8, 1))
    y = pl.pallas_call(k, out_shape=jax.ShapeDtypeStruct((8, 128), jnp.float32))(x)
    # numpy convention: out[i] == in[i - shift]  ->  out[0, 1] == in[0, 0] == 0
    return bool(y[0, 1] == 0.0)


# ----------------------------------------------------------------------------
# GroupNorm on a (C, N*HW) f32 block: per-(sample, group) stats via tiny
# segment / membership matmuls, two-pass (mean, then centred variance).
# ----------------------------------------------------------------------------
def _group_norm(y, seg, seg_t, mem_gc, mem_cg, gamma, beta, eps, hw):
    G, C = mem_gc.shape
    inv_cnt = 1.0 / float(hw * (C // G))
    sums_cn = jnp.dot(y, seg, preferred_element_type=jnp.float32)            # (C, N)
    gmean = jnp.dot(mem_gc, sums_cn, preferred_element_type=jnp.float32) * inv_cnt
    mean_c = jnp.dot(mem_cg, gmean, preferred_element_type=jnp.float32)      # (C, N)
    mean = jnp.dot(mean_c, seg_t, preferred_element_type=jnp.float32)        # (C, NHW)
    diff = y - mean
    ssq_cn = jnp.dot(diff * diff, seg, preferred_element_type=jnp.float32)   # (C, N)
    gvar = jnp.dot(mem_gc, ssq_cn, preferred_element_type=jnp.float32) * inv_cnt
    ginv = lax.rsqrt(gvar + eps)                                             # (G, N)
    inv_c = jnp.dot(mem_cg, ginv, preferred_element_type=jnp.float32)        # (C, N)
    inv = jnp.dot(inv_c, seg_t, preferred_element_type=jnp.float32)          # (C, NHW)
    return diff * inv * gamma + beta


# ----------------------------------------------------------------------------
# Fused kernel: 3x3 "same" conv (+ bias) [+ GN + SiLU] [+ residual add]
#               [+ second GN (norm_out)] [+ 2*tanh]
# ----------------------------------------------------------------------------
def _fused_conv_kernel(*refs, HW, NHW, shifts, has_gn1, has_gn2, use_silu,
                       has_shortcut, use_tanh2, eps1, eps2):
    it = iter(refs)
    x_ref, w_ref, b_ref, m_ref = next(it), next(it), next(it), next(it)
    seg_ref = segt_ref = None
    if has_gn1 or has_gn2:
        seg_ref, segt_ref = next(it), next(it)
    gn1 = [next(it) for _ in range(4)] if has_gn1 else None
    sc_ref = next(it) if has_shortcut else None
    gn2 = [next(it) for _ in range(4)] if has_gn2 else None
    o_ref = next(it)

    cout = w_ref.shape[1]
    x = x_ref[...]                                    # (Cin, N*HW) bf16, lane-dense

    # 3x3 convolution: nine in-register lane rotations (XLU) + boundary masks,
    # nine MXU matmuls accumulated in f32 (no im2col materialisation).
    acc = jnp.zeros((cout, NHW), jnp.float32)
    for k in range(9):
        if shifts[k] == 0:                            # centre tap: always valid
            tap = x
        else:
            tap = pltpu.roll(x, shifts[k], 1) * m_ref[pl.ds(k, 1), :]
        acc = acc + jnp.dot(w_ref[k], tap, preferred_element_type=jnp.float32)
    acc = acc + b_ref[...]                            # (Cout, 1) bias broadcast

    if has_gn1 or has_gn2:
        seg, seg_t = seg_ref[...], segt_ref[...]

    y = acc
    if has_gn1:
        y = _group_norm(y, seg, seg_t, gn1[0][...], gn1[1][...],
                        gn1[2][...], gn1[3][...], eps1, HW)
    if use_silu:
        y = y * jax.nn.sigmoid(y)
    if has_shortcut:
        y = y + sc_ref[...].astype(jnp.float32)       # fused residual add
    if has_gn2:                                       # fused norm_out (GN 32)
        y = _group_norm(y, seg, seg_t, gn2[0][...], gn2[1][...],
                        gn2[2][...], gn2[3][...], eps2, HW)
    if use_tanh2:
        y = 2.0 * jnp.tanh(y)
    o_ref[...] = y.astype(o_ref.dtype)


def fused_conv3x3(x, w, b, *, H, W, N, gn1=None, silu=False, shortcut=None,
                  gn2=None, tanh2=False, out_dtype=ACT_DTYPE):
    """Fused 3x3 'same' convolution (+ optional epilogues) as ONE pallas_call.

    x        : (Cin, N*H*W) activations (channel-major, lane-dense spatial axis)
    w, b     : PyTorch Conv2d parameters, (Cout, Cin, 3, 3) and (Cout,)
    gn1, gn2 : None or (gamma, beta, num_groups, eps)
    shortcut : None or (Cout, N*H*W) tensor added after GN1 + SiLU
    """
    Cout, Cin = w.shape[0], w.shape[1]
    HW, NHW = H * W, N * H * W
    assert x.shape == (Cin, NHW), (x.shape, (Cin, NHW))

    numpy_roll = _roll_matches_numpy()

    # Static lane shifts and boundary-validity masks for the nine taps.
    q = jnp.arange(NHW, dtype=jnp.int32)
    ii = (q % HW) // W
    jj = q % W
    shifts, mask_rows = [], []
    for dy in range(3):
        for dx in range(3):
            s = (dy - 1) * W + (dx - 1)
            shifts.append(((-s) % NHW) if numpy_roll else (s % NHW))
            io, jo = ii + (dy - 1), jj + (dx - 1)
            mask_rows.append((io >= 0) & (io < H) & (jo >= 0) & (jo < W))
    masks = jnp.stack(mask_rows, axis=0).astype(ACT_DTYPE)           # (9, NHW)

    w9 = jnp.transpose(w, (2, 3, 0, 1)).reshape(9, Cout, Cin).astype(ACT_DTYPE)
    operands = [x.astype(ACT_DTYPE), w9,
                b.reshape(Cout, 1).astype(jnp.float32), masks]

    if gn1 is not None or gn2 is not None:
        seg = (q[:, None] // HW ==
               jnp.arange(N, dtype=jnp.int32)[None, :]).astype(jnp.float32)
        operands += [seg, seg.T]                          # (NHW, N), (N, NHW)

    def gn_ops(gn):
        gamma, beta, groups, eps = gn
        C = gamma.shape[0]
        assert C % groups == 0
        mem = (jnp.arange(C, dtype=jnp.int32)[None, :] // (C // groups) ==
               jnp.arange(groups, dtype=jnp.int32)[:, None]).astype(jnp.float32)
        return [mem, mem.T, gamma.reshape(C, 1).astype(jnp.float32),
                beta.reshape(C, 1).astype(jnp.float32)], float(eps)

    eps1 = eps2 = 0.0
    if gn1 is not None:
        ops, eps1 = gn_ops(gn1)
        operands += ops
    if shortcut is not None:
        operands.append(shortcut.astype(ACT_DTYPE))
    if gn2 is not None:
        ops, eps2 = gn_ops(gn2)
        operands += ops

    kernel = functools.partial(
        _fused_conv_kernel, HW=HW, NHW=NHW, shifts=tuple(shifts),
        has_gn1=gn1 is not None, has_gn2=gn2 is not None, use_silu=silu,
        has_shortcut=shortcut is not None, use_tanh2=tanh2,
        eps1=eps1, eps2=eps2)

    # Whole problem fits VMEM many times over at these sizes -> single grid
    # step with full blocks (minimises per-step / per-launch overhead).
    return pl.pallas_call(
        kernel,
        out_shape=jax.ShapeDtypeStruct((Cout, NHW), out_dtype),
    )(*operands)


# ----------------------------------------------------------------------------
# Module-level forward functions (everything hot runs inside fused kernels)
# ----------------------------------------------------------------------------
def residual_block(x, p, *, H, W, N, gn2=None):
    x1 = fused_conv3x3(x, p["w1"], p["b1"], H=H, W=W, N=N,
                       gn1=(p["g1"], p["be1"], 8, 1e-5), silu=True)
    shortcut = x if p["same"] else x1
    return fused_conv3x3(x1, p["w2"], p["b2"], H=H, W=W, N=N,
                         gn1=(p["g2"], p["be2"], 8, 1e-5), silu=True,
                         shortcut=shortcut, gn2=gn2)


def downsample(x, w, b, *, H, W, N):
    # torch: F.pad(x, (0,1,0,1)) -> Conv2d(k=3, stride=2, padding=0)
    # == odd-indexed samples of the stride-1 "same" convolution.
    C = w.shape[0]
    y = fused_conv3x3(x, w, b, H=H, W=W, N=N)               # (C, N*H*W)
    y = y.reshape(C, N, H, W)[:, :, 1::2, 1::2]
    Ho, Wo = H // 2, W // 2
    return y.reshape(C, N * Ho * Wo), Ho, Wo


def encoder_forward(params, x_nchw):
    N, Cin, H, W = x_nchw.shape
    # NCHW -> lane-dense (C, N*H*W)
    x = jnp.transpose(x_nchw, (1, 0, 2, 3)).reshape(Cin, N * H * W)
    x = fused_conv3x3(x.astype(ACT_DTYPE), *params["conv_in"], H=H, W=W, N=N)

    for blk in params["down"]:
        for rp in blk["res"]:
            x = residual_block(x, rp, H=H, W=W, N=N)
        if blk["downsample"] is not None:
            w, b = blk["downsample"]
            x, H, W = downsample(x, w, b, H=H, W=W, N=N)

    # middle residual block with the encoder's norm_out (GroupNorm(32), eps
    # 1e-6) fused into the second kernel's epilogue.
    g_out, b_out = params["norm_out"]
    x = residual_block(x, params["middle"], H=H, W=W, N=N,
                       gn2=(g_out, b_out, 32, 1e-6))

    # conv_out with fused 2*tanh epilogue.
    w, b = params["conv_out"]
    Cout = w.shape[0]
    y = fused_conv3x3(x, w, b, H=H, W=W, N=N, tanh2=True, out_dtype=jnp.float32)
    return jnp.transpose(y.reshape(Cout, N, H, W), (1, 0, 2, 3))    # back to NCHW


# ----------------------------------------------------------------------------
# Pure-JAX f32 reference (mirrors the PyTorch module) for a correctness check
# ----------------------------------------------------------------------------
def _conv2d_ref(x, w, b, stride=1, padding=((1, 1), (1, 1))):
    y = lax.conv_general_dilated(x, w, window_strides=(stride, stride),
                                 padding=padding,
                                 dimension_numbers=("NCHW", "OIHW", "NCHW"))
    return y + b.reshape(1, -1, 1, 1)


def _groupnorm_ref(x, gamma, beta, groups, eps):
    N, C, H, W = x.shape
    xg = x.reshape(N, groups, C // groups, H, W)
    mean = xg.mean(axis=(2, 3, 4), keepdims=True)
    var = ((xg - mean) ** 2).mean(axis=(2, 3, 4), keepdims=True)
    xn = ((xg - mean) / jnp.sqrt(var + eps)).reshape(N, C, H, W)
    return xn * gamma.reshape(1, C, 1, 1) + beta.reshape(1, C, 1, 1)


def _silu(x):
    return x * jax.nn.sigmoid(x)


def _res_block_ref(x, p):
    x1 = _silu(_groupnorm_ref(_conv2d_ref(x, p["w1"], p["b1"]),
                              p["g1"], p["be1"], 8, 1e-5))
    out = _silu(_groupnorm_ref(_conv2d_ref(x1, p["w2"], p["b2"]),
                               p["g2"], p["be2"], 8, 1e-5))
    return out + (x if p["same"] else x1)


def encoder_forward_ref(params, x):
    x = _conv2d_ref(x, *params["conv_in"])
    for blk in params["down"]:
        for rp in blk["res"]:
            x = _res_block_ref(x, rp)
        if blk["downsample"] is not None:
            w, b = blk["downsample"]
            x = jnp.pad(x, ((0, 0), (0, 0), (0, 1), (0, 1)))
            x = _conv2d_ref(x, w, b, stride=2, padding=((0, 0), (0, 0)))
    x = _res_block_ref(x, params["middle"])
    g, be = params["norm_out"]
    x = _groupnorm_ref(x, g, be, 32, 1e-6)
    x = _conv2d_ref(x, *params["conv_out"])
    return 2.0 * jnp.tanh(x)


# ----------------------------------------------------------------------------
# Deterministic parameter construction (synthetic, no checkpoint)
# ----------------------------------------------------------------------------
def _conv_params(key, cin, cout):
    k1, k2 = jax.random.split(key)
    w = jax.random.normal(k1, (cout, cin, 3, 3), jnp.float32) / jnp.sqrt(9.0 * cin)
    b = 0.01 * jax.random.normal(k2, (cout,), jnp.float32)
    return w, b


def _gn_params(key, c):
    k1, k2 = jax.random.split(key)
    gamma = 1.0 + 0.05 * jax.random.normal(k1, (c,), jnp.float32)
    beta = 0.05 * jax.random.normal(k2, (c,), jnp.float32)
    return gamma, beta


def _res_params(key, cin, cout):
    ks = jax.random.split(key, 4)
    w1, b1 = _conv_params(ks[0], cin, cout)
    g1, be1 = _gn_params(ks[1], cout)
    w2, b2 = _conv_params(ks[2], cout, cout)
    g2, be2 = _gn_params(ks[3], cout)
    return dict(w1=w1, b1=b1, g1=g1, be1=be1,
                w2=w2, b2=b2, g2=g2, be2=be2, same=(cin == cout))


def make_encoder_params(key, in_channels, out_channels, channels,
                        channel_multiplier, n_res_blocks=1):
    keys = iter(jax.random.split(key, 64))
    params = {}
    params["conv_in"] = _conv_params(next(keys), in_channels, channels)
    in_mult = [1] + list(channel_multiplier)
    down = []
    for i, mult in enumerate(channel_multiplier):
        block_in = channels * in_mult[i]
        block_out = channels * mult
        res = []
        for _ in range(n_res_blocks):
            res.append(_res_params(next(keys), block_in, block_out))
            block_in = block_out
        ds = None
        if i != len(channel_multiplier) - 1:
            ds = _conv_params(next(keys), block_in, block_in)
        down.append(dict(res=res, downsample=ds))
    params["down"] = down
    block_in = channels * channel_multiplier[-1]
    params["middle"] = _res_params(next(keys), block_in, block_in)
    params["norm_out"] = _gn_params(next(keys), block_in)   # GroupNorm(32, block_in)
    params["conv_out"] = _conv_params(next(keys), block_in, out_channels)
    return params


# ----------------------------------------------------------------------------
if __name__ == "__main__":
    key = jax.random.PRNGKey(0)
    kp, kx = jax.random.split(key)

    # Encoder(in_channels=3, out_channels=4, channels=16,
    #         channel_multiplier=[1, 2], n_res_blocks=1)
    params = make_encoder_params(kp, in_channels=3, out_channels=4, channels=16,
                                 channel_multiplier=[1, 2], n_res_blocks=1)
    x = jax.random.normal(kx, (2, 3, 16, 16), jnp.float32)   # NCHW like PyTorch

    _roll_matches_numpy()                 # resolve rotate direction before jit

    fwd = jax.jit(lambda xx: encoder_forward(params, xx))
    y = jax.block_until_ready(fwd(x))

    assert y.shape == (2, 4, 8, 8), y.shape                  # one Downsample: 16 -> 8
    assert bool(jnp.all(jnp.isfinite(y)))
    assert bool(jnp.all(jnp.abs(y) <= 2.0))                  # output is 2*tanh(...)

    # Cross-check against a pure-JAX float32 reference of the PyTorch module
    # (generous tolerance accounts for bf16 activation/weight storage).
    y_ref = jax.block_until_ready(encoder_forward_ref(params, x))
    max_err = float(jnp.max(jnp.abs(y - y_ref)))
    assert max_err < 0.3, max_err

    print("KERNEL_OK")
</pallas_src>

<mosaic_0001>
module attributes {stable_mosaic.version = 11 : i64} {
  func.func @k(%arg0: memref<8x128xf32, #tpu.memory_space<vmem>>, %arg1: memref<8x128xf32, #tpu.memory_space<vmem>>) attributes {dimension_semantics = [], scalar_prefetch = 0 : i64, scratch_operands = 0 : i64, tpu.core_type = #tpu.core_type<tc>} {
    %c0 = arith.constant 0 : index
    %c0_0 = arith.constant 0 : index
    %0 = vector.load %arg0[%c0, %c0_0] : memref<8x128xf32, #tpu.memory_space<vmem>>, vector<8x128xf32>
    %c1_i32 = arith.constant 1 : i32
    %1 = tpu.dynamic_rotate %0 by %c1_i32 dim 1 : vector<8x128xf32>, i32 -> vector<8x128xf32>
    %c0_1 = arith.constant 0 : index
    %c0_2 = arith.constant 0 : index
    %2 = vector.load %arg1[%c0_1, %c0_2] : memref<8x128xf32, #tpu.memory_space<vmem>>, vector<8x128xf32>
    tpu.vector_store %arg1[%c0_1, %c0_2], %1 {strides = array<i32>} : memref<8x128xf32, #tpu.memory_space<vmem>>, vector<8x128xf32>,
    return
  }
}

</mosaic_0001>

<bundles_post_ra>
// kernel: tpu_custom_call.1
= control target key start
LH: loop header
LB: loop body
LE: loop exit
PB: predicated region body
PF: predicated region fallthrough
CT: control target
= control target key end

     0   :  { %6 = vsyncpa [#allocation3], 0  ;;  %s106_s0 = inlined_call_operand.hbm [shape: f32[8,128], index: 0, kind: input, shape index: {}]   ;;  %s107_s1 = inlined_call_operand.hbm [shape: f32[8,128], index: 1, kind: output, shape index: {}]  }
   0x1   :  { %7 = vsyncpa [#allocation4], 0  ;;  %s87_s6 = smov [#allocation2]  }
   0x2   :  { %s14_s7 = sshll.u32 %s87_s6, 4  ;;  %s15_s7 = int_to_ptr.vmem [resolvable:$true] %s14_s7 }
   0x3   :  { %s51_s8 = scalar_lea.vmem %s15_s7, 128  ;;  %p56_p1 = scmp.lt.s32.totalorder %s15_s7, %s15_s7 }
   0x4   :  { %p52_p0 = scmp.ne.s32.totalorder %s15_s7, %s51_s8  ;;  %p57_p2 = scmp.lt.s32.totalorder %s51_s8, %s51_s8 }
   0x6   :  { %p58_p3 = por %p57_p2, %p56_p1 }
   0x8   :  { %p59_p4 = pnand %p58_p3, %p52_p0 }
   0xa   :  { %62 = shalt.err (!%p59_p4)
}
   0xb   :  { %17 = dma.hbm_to_vmem [thread:$0]  %s106_s0, 128, %s15_s7, [#allocation3]  }
   0xc   :  { %83 = dma.done.wait [#allocation3], 128  }
   0xd   :  { %84 = vsyncadd [#allocation3], 4294967168  ;;  %v21_v0 = vld [vmem:[#allocation2] sm:$0xff]  ;;  %s88_s11 = smov 1   ;;  %s89_s12 = smov [#allocation5]  }
   0xe   :  { %22 = vrot.lane.b32.xlu0 %v21_v0, %s88_s11  ;;  %s31_s13 = sshll.u32 %s89_s12, 4  ;;  %s32_s13 = int_to_ptr.vmem [resolvable:$true] %s31_s13 }
   0xf   :  { %s63_s14 = scalar_lea.vmem %s32_s13, 128  ;;  %p68_p6 = scmp.lt.s32.totalorder %s32_s13, %s32_s13 }
  0x10   :  { %p64_p5 = scmp.ne.s32.totalorder %s32_s13, %s63_s14  ;;  %p69_p7 = scmp.lt.s32.totalorder %s63_s14, %s63_s14 }
  0x12   :  { %p70_p8 = por %p69_p7, %p68_p6 }
  0x14   :  { %p71_p9 = pnand %p70_p8, %p64_p5 }
  0x80   :  { %v23_v1 = vpop.permute.xlu0 %22 }
  0x81   :  { %24 = vst [vmem:[#allocation5] sm:$0xff] %v23_v1 }
  0x82   :  { %74 = shalt.err (!%p71_p9)
}
  0x83   :  { %34 = dma.vmem_to_hbm [thread:$0]  %s32_s13, 128, %s107_s1, [#allocation4]  }
  0x84   :  { %85 = dma.done.wait [#allocation4], 128  }
  0x85   :  { %86 = vsyncadd [#allocation4], 4294967168 }
  0x86   :  { %38 = vsyncpa [#allocation3], 1 }
  0x87   :  { %39 = vsyncpa [#allocation4], 1 }

</bundles_post_ra>
